<compile_context>
chip_gen: v7x
topology: tpu7x:2x2x1
jax: 0.10.0
libtpu: 0.0.40
codegen_flags: <defaults>
</compile_context>

<pallas_src>
import functools

import jax
import jax.numpy as jnp
from jax.experimental import pallas as pl
from jax.experimental.pallas import tpu as pltpu


def gcn_kernel(adj_ref, xw_ref, b_ref, o_ref, *, tk, xw_resident):
    k = pl.program_id(1)

    # Fold the bias into the reduction init: o starts at broadcast(b).
    @pl.when(k == 0)
    def _():
        o_ref[...] = jnp.broadcast_to(b_ref[...], o_ref.shape)

    if xw_resident:
        # xw lives fully in VMEM; grab the K-slab for this grid step.
        start = pl.multiple_of(k * tk, 128)
        xw_blk = xw_ref[pl.ds(start, tk), :]
    else:
        xw_blk = xw_ref[...]

    # Single MXU matmul per tile: bf16 x bf16 -> f32 accumulate into o_ref.
    o_ref[...] += jnp.dot(adj_ref[...], xw_blk,
                          preferred_element_type=jnp.float32)


def _round_up(a, m):
    return ((a + m - 1) // m) * m


def gcn_layer(adj, x, w, b):
    N, in_dim = x.shape
    out_dim = w.shape[0]
    assert adj.shape == (N, N)
    assert w.shape == (out_dim, in_dim)
    assert b.shape == (out_dim,)

    adj = adj.astype(jnp.float32)
    x = x.astype(jnp.float32)
    w = w.astype(jnp.float32)
    b = b.astype(jnp.float32)

    # ---- wrapper-side precompute (one-time XLA ops) -------------------------
    # Reassociate: (adj @ x) @ W.T == adj @ (x @ W.T)   (eval-mode dropout).
    xw = x @ w.T                                           # [N, out_dim], f32

    # ---- tiling (cdiv + zero padding; no divisor fallback) ------------------
    # Row tile: one tile for small N; 256-aligned tiles (>=2 tiles -> both
    # v7x TensorCores busy) for larger N.
    if N <= 256:
        tm = _round_up(max(N, 8), 8)
    else:
        tm = 256
    # K tile: one lane-aligned tile for small N; 512 otherwise.
    if N <= 512:
        tk = _round_up(max(N, 128), 128)
    else:
        tk = 512

    n_rows_pad = _round_up(N, tm)
    k_pad = _round_up(N, tk)
    out_pad = max(128, _round_up(out_dim, 128))            # lane-dense stores
    grid = (n_rows_pad // tm, k_pad // tk)

    # Zero padding is exact: extra adj columns / xw rows contribute 0, padded
    # output rows/cols are sliced off.
    adj_p = jnp.zeros((n_rows_pad, k_pad), jnp.float32).at[:N, :N].set(adj)
    xw_p = jnp.zeros((k_pad, out_pad), jnp.float32).at[:N, :out_dim].set(xw)
    b_p = jnp.zeros((1, out_pad), jnp.float32).at[0, :out_dim].set(b)

    # bf16 MXU inputs; accumulation stays f32 via preferred_element_type.
    adj_bf = adj_p.astype(jnp.bfloat16)
    xw_bf = xw_p.astype(jnp.bfloat16)

    # Keep xw fully VMEM-resident when it is small (avoids re-streaming it
    # from HBM once per row tile).
    xw_full_bytes = k_pad * out_pad * 2
    xw_resident = xw_full_bytes <= (4 << 20)
    if xw_resident:
        xw_spec = pl.BlockSpec((k_pad, out_pad), lambda i, k: (0, 0))
        xw_block_rows = k_pad
    else:
        xw_spec = pl.BlockSpec((tk, out_pad), lambda i, k: (k, 0))
        xw_block_rows = tk

    # ---- VMEM budget --------------------------------------------------------
    vmem_bytes = (
        2 * tm * tk * 2                     # adj bf16 double buffer
        + 2 * xw_block_rows * out_pad * 2   # xw bf16 (budget 2 buffers)
        + 2 * tm * out_pad * 4              # f32 output double buffer
        + 2 * out_pad * 4                   # bias
    )
    try:
        vmem_cap = int(pltpu.get_tpu_info().vmem_capacity_bytes)
    except Exception:
        vmem_cap = 64 << 20                 # conservative (v7x per-core VMEM)
    vmem_limit = max(vmem_bytes + (8 << 20), 32 << 20)
    vmem_limit = min(vmem_limit, vmem_cap - (8 << 20))

    kernel = functools.partial(gcn_kernel, tk=tk, xw_resident=xw_resident)

    out = pl.pallas_call(
        kernel,
        out_shape=jax.ShapeDtypeStruct((n_rows_pad, out_pad), jnp.float32),
        grid_spec=pltpu.PrefetchScalarGridSpec(
            num_scalar_prefetch=0,
            grid=grid,
            in_specs=[
                pl.BlockSpec((tm, tk), lambda i, k: (i, k)),   # adj tile
                xw_spec,                                       # xw (resident or tiled)
                pl.BlockSpec((1, out_pad), lambda i, k: (0, 0)),  # bias
            ],
            out_specs=pl.BlockSpec((tm, out_pad), lambda i, k: (i, 0)),
        ),
        compiler_params=pltpu.CompilerParams(
            dimension_semantics=("parallel", "arbitrary"),
            vmem_limit_bytes=vmem_limit,
        ),
    )(adj_bf, xw_bf, b_p)

    return out[:N, :out_dim]


def reference(adj, x, w, b):
    h = adj @ x
    return h @ w.T + b[None, :]


if __name__ == "__main__":
    key = jax.random.PRNGKey(0)
    k_adj, k_x, k_w, k_b = jax.random.split(key, 4)

    N, in_dim, out_dim = 128, 32, 8  # small synthetic GCN problem

    # Symmetric, row-normalized adjacency (dense, deterministic).
    a_raw = (jax.random.uniform(k_adj, (N, N)) > 0.8).astype(jnp.float32)
    adj = a_raw + a_raw.T + jnp.eye(N, dtype=jnp.float32)
    deg = jnp.clip(adj.sum(axis=1, keepdims=True), 1.0, None)
    adj = adj / deg

    x = jax.random.normal(k_x, (N, in_dim), dtype=jnp.float32)

    # nn.Linear(in_dim, out_dim) default init: U(-1/sqrt(in_dim), 1/sqrt(in_dim))
    bound = 1.0 / (in_dim ** 0.5)
    w = jax.random.uniform(k_w, (out_dim, in_dim), minval=-bound, maxval=bound,
                           dtype=jnp.float32)
    b = jax.random.uniform(k_b, (out_dim,), minval=-bound, maxval=bound,
                           dtype=jnp.float32)

    out = gcn_layer(adj, x, w, b)
    out = jax.block_until_ready(out)

    ref = reference(adj, x, w, b)
    assert out.shape == (N, out_dim)
    # bf16 MXU inputs with f32 accumulation: relaxed vs. the pure-f32 path.
    assert jnp.allclose(out, ref, atol=2e-2, rtol=2e-2), (
        float(jnp.max(jnp.abs(out - ref))))

    print("KERNEL_OK")
</pallas_src>

<mosaic_0001>
module attributes {stable_mosaic.version = 11 : i64} {
  func.func @gcn_kernel(%arg0: i32, %arg1: i32, %arg2: memref<128x128xbf16, #tpu.memory_space<vmem>>, %arg3: memref<128x128xbf16, #tpu.memory_space<vmem>>, %arg4: memref<1x128xf32, #tpu.memory_space<vmem>>, %arg5: memref<128x128xf32, #tpu.memory_space<vmem>>) attributes {dimension_semantics = [#tpu.dimension_semantics<parallel>, #tpu.dimension_semantics<arbitrary>], iteration_bounds = array<i64: 1, 1>, scalar_prefetch = 0 : i64, scratch_operands = 0 : i64, tpu.core_type = #tpu.core_type<tc>, window_params = [{transform_indices = @transform_0, window_bounds = array<i64: 128, 128>}, {pipeline_mode = #tpu.pipeline_mode<synchronous>, transform_indices = @transform_1, window_bounds = array<i64: 128, 128>}, {pipeline_mode = #tpu.pipeline_mode<synchronous>, transform_indices = @transform_2, window_bounds = array<i64: 1, 128>}, {transform_indices = @transform_3, window_bounds = array<i64: 128, 128>}]} {
    %c0_i32 = arith.constant 0 : i32
    %0 = arith.cmpi eq, %arg1, %c0_i32 : i32
    %1 = arith.extui %0 : i1 to i32
    %c0_i32_0 = arith.constant 0 : i32
    %2 = arith.cmpi ne, %1, %c0_i32_0 : i32
    scf.if %2 {
      %c0_7 = arith.constant 0 : index
      %c0_8 = arith.constant 0 : index
      %12 = vector.load %arg4[%c0_7, %c0_8] : memref<1x128xf32, #tpu.memory_space<vmem>>, vector<1x128xf32>
      %13 = vector.shape_cast %12 : vector<1x128xf32> to vector<1x128xf32>
      %14 = vector.broadcast %13 : vector<1x128xf32> to vector<128x128xf32>
      %c0_9 = arith.constant 0 : index
      %c0_10 = arith.constant 0 : index
      %15 = vector.load %arg5[%c0_9, %c0_10] : memref<128x128xf32, #tpu.memory_space<vmem>>, vector<128x128xf32>
      tpu.vector_store %arg5[%c0_9, %c0_10], %14 {strides = array<i32>} : memref<128x128xf32, #tpu.memory_space<vmem>>, vector<128x128xf32>,
    } else {
    }
    %c128_i32 = arith.constant 128 : i32
    %3 = arith.muli %arg1, %c128_i32 : i32
    %4 = tpu.assume_multiple %3, 128 : i32
    %5 = arith.index_cast %4 : i32 to index
    %c0 = arith.constant 0 : index
    %6 = vector.load %arg3[%5, %c0] : memref<128x128xbf16, #tpu.memory_space<vmem>>, vector<128x128xbf16>
    %c0_1 = arith.constant 0 : index
    %c0_2 = arith.constant 0 : index
    %7 = vector.load %arg5[%c0_1, %c0_2] : memref<128x128xf32, #tpu.memory_space<vmem>>, vector<128x128xf32>
    %c0_3 = arith.constant 0 : index
    %c0_4 = arith.constant 0 : index
    %8 = vector.load %arg2[%c0_3, %c0_4] : memref<128x128xbf16, #tpu.memory_space<vmem>>, vector<128x128xbf16>
    %cst = arith.constant dense<0.000000e+00> : vector<128x128xf32>
    %9 = tpu.matmul %8, %6, %cst {dimension_numbers = #tpu.dot_dimension_numbers<[1], [0], [0], [1], [0, 0, 1, 1], [], []>} : vector<128x128xbf16>, vector<128x128xbf16>, vector<128x128xf32> -> vector<128x128xf32>
    %10 = arith.addf %7, %9 : vector<128x128xf32>
    %c0_5 = arith.constant 0 : index
    %c0_6 = arith.constant 0 : index
    %11 = vector.load %arg5[%c0_5, %c0_6] : memref<128x128xf32, #tpu.memory_space<vmem>>, vector<128x128xf32>
    tpu.vector_store %arg5[%c0_5, %c0_6], %10 {strides = array<i32>} : memref<128x128xf32, #tpu.memory_space<vmem>>, vector<128x128xf32>,
    return
  }
  func.func @transform_0(%arg0: i32, %arg1: i32) -> (i32, i32) {
    %c0_i32 = arith.constant 0 : i32
    return %arg0, %arg1 : i32, i32
  }
  func.func @transform_1(%arg0: i32, %arg1: i32) -> (i32, i32) {
    %c0_i32 = arith.constant 0 : i32
    %c0_i32_0 = arith.constant 0 : i32
    %c0_i32_1 = arith.constant 0 : i32
    return %c0_i32, %c0_i32_0 : i32, i32
  }
  func.func @transform_2(%arg0: i32, %arg1: i32) -> (i32, i32) {
    %c0_i32 = arith.constant 0 : i32
    %c0_i32_0 = arith.constant 0 : i32
    %c0_i32_1 = arith.constant 0 : i32
    return %c0_i32, %c0_i32_0 : i32, i32
  }
  func.func @transform_3(%arg0: i32, %arg1: i32) -> (i32, i32) {
    %c0_i32 = arith.constant 0 : i32
    %c0_i32_0 = arith.constant 0 : i32
    return %arg0, %c0_i32 : i32, i32
  }
}

</mosaic_0001>

<bundles_post_ra>
// kernel: tpu_custom_call.1
= control target key start
LH: loop header
LB: loop body
LE: loop exit
PB: predicated region body
PF: predicated region fallthrough
CT: control target
= control target key end

     0   :  { %8 = vsyncpa [#allocation3], 0  ;;  %s611_s0 = inlined_call_operand.hbm [shape: bf16[128,128], index: 0, kind: input, shape index: {}]   ;;  %s612_s1 = inlined_call_operand.hbm [shape: bf16[128,128], index: 1, kind: input, shape index: {}]   ;;  %s613_s2 = inlined_call_operand.vmem [shape: f32[1,128], index: 2, kind: input, shape index: {}]   ;;  %s614_s3 = inlined_call_operand.hbm [shape: f32[128,128], index: 3, kind: output, shape index: {}]  }
   0x1   :  { %9 = vsyncpa [#allocation6], 0 }
   0x2   :  { %10 = vsyncpa [#allocation4], 0  ;;  %s545_s12 = smov [#allocation2]   ;;  %s473_s16 = scalar_lea.hbm %s611_s0, 1024 }
   0x3   :  { %s16_s13 = sshll.u32 %s545_s12, 4  ;;  %p474_p0 = scmp.ne.s32.totalorder %s611_s0, %s473_s16  ;;  %s17_s13 = int_to_ptr.vmem [resolvable:$true] %s16_s13 }
   0x4   :  { %p477_p1 = scmp.lt.u32.totalorder %s473_s16, %s611_s0 }
   0x6   :  { %p479_p2 = pnand %p477_p1, %p474_p0 }
   0x8   :  { %482 = shalt.err (!%p479_p2)
}
   0x9   :  { %s483_s21 = scalar_lea.vmem %s17_s13, 1024  ;;  %p488_p4 = scmp.lt.s32.totalorder %s17_s13, %s17_s13 }
   0xa   :  { %p484_p3 = scmp.ne.s32.totalorder %s17_s13, %s483_s21  ;;  %p489_p5 = scmp.lt.s32.totalorder %s483_s21, %s483_s21 }
   0xc   :  { %p490_p6 = por %p489_p5, %p488_p4 }
   0xe   :  { %p491_p7 = pnand %p490_p6, %p484_p3 }
  0x10   :  { %494 = shalt.err (!%p491_p7)
}
  0x11   :  { %s546_s22 = smov 64   ;;  %s547_s23 = smov 4  }
  0x12   :  { %22 = dma.hbm_to_vmem [thread:$0]  %s611_s0, 1024, %s17_s13, [#allocation3], %s546_s22, %s546_s22, %s547_s23  }
  0x13   :  { %s548_s26 = smov [#allocation5]   ;;  %s495_s30 = scalar_lea.hbm %s612_s1, 1024 }
  0x14   :  { %s28_s27 = sshll.u32 %s548_s26, 4  ;;  %p496_p8 = scmp.ne.s32.totalorder %s612_s1, %s495_s30  ;;  %s29_s27 = int_to_ptr.vmem [resolvable:$true] %s28_s27 }
  0x15   :  { %p499_p9 = scmp.lt.u32.totalorder %s495_s30, %s612_s1 }
  0x17   :  { %p501_p10 = pnand %p499_p9, %p496_p8 }
  0x19   :  { %504 = shalt.err (!%p501_p10)
}
  0x1a   :  { %s505_s8 = scalar_lea.vmem %s29_s27, 1024  ;;  %p510_p12 = scmp.lt.s32.totalorder %s29_s27, %s29_s27 }
  0x1b   :  { %p506_p11 = scmp.ne.s32.totalorder %s29_s27, %s505_s8  ;;  %p511_p13 = scmp.lt.s32.totalorder %s505_s8, %s505_s8 }
  0x1d   :  { %p512_p0 = por %p511_p13, %p510_p12 }
  0x1f   :  { %p513_p1 = pnand %p512_p0, %p506_p11 }
  0x21   :  { %516 = shalt.err (!%p513_p1)
}
  0x22   :  { %34 = dma.hbm_to_vmem [thread:$0]  %s612_s1, 1024, %s29_s27, [#allocation6], %s546_s22, %s546_s22, %s547_s23  }
  0x23   :  { %539 = dma.done.wait [#allocation3], 1024  }
  0x24   :  { %540 = vsyncadd [#allocation3], 4294966272 }
  0x25   :  { %541 = dma.done.wait [#allocation6], 1024  }
  0x26   :  { %542 = vsyncadd [#allocation6], 4294966272  ;;  %v457_v0 = vld [vmem:[#allocation5] sm:$0xff]   ;;  %v458_v1 = vld [vmem:[#allocation5 + $0x8] sm:$0xff]  }
  0x27   :  { %402 = vmatprep.subr.bf16.mxu0 %v457_v0  ;;  %434 = vmatprep.subr.bf16.mxu1 %v457_v0  ;;  %v459_v2 = vld [vmem:[#allocation5 + $0x10] sm:$0xff]   ;;  %v460_v3 = vld [vmem:[#allocation5 + $0x18] sm:$0xff]   ;;  %v465_v4 = vld [vmem:[#allocation2] sm:$0xff]  }
  0x28   :  { %403 = vmatpush3.bf16.msra.mxu0 %v457_v0  ;;  %442 = vmatpush3.bf16.msra.mxu1 %v457_v0  ;;  %v466_v5 = vld [vmem:[#allocation2 + $0x20] sm:$0xff]   ;;  %v462_v7 = vld [vmem:[#allocation5 + $0x28] sm:$0xff]   ;;  %v463_v8 = vld [vmem:[#allocation5 + $0x30] sm:$0xff]  }
  0x29   :  { %404 = vmatprep.subr.bf16.mxu0 %v458_v1  ;;  %435 = vmatprep.subr.bf16.mxu1 %v458_v1  ;;  %v461_v6 = vld [vmem:[#allocation5 + $0x20] sm:$0xff]   ;;  %v464_v9 = vld [vmem:[#allocation5 + $0x38] sm:$0xff]   ;;  %v467_v10 = vld [vmem:[#allocation2 + $0x8] sm:$0xff]  }
  0x2a   :  { %418 = vmatprep.mubr.bf16.mxu0 %v465_v4  ;;  %426 = vmatprep.mubr.bf16.mxu1 %v466_v5  ;;  %v468_v11 = vld [vmem:[#allocation2 + $0x28] sm:$0xff]   ;;  %v469_v12 = vld [vmem:[#allocation2 + $0x10] sm:$0xff]   ;;  %v471_v14 = vld [vmem:[#allocation2 + $0x18] sm:$0xff]  }
  0x2b   :  { %v470_v13 = vld [vmem:[#allocation2 + $0x30] sm:$0xff]   ;;  %v472_v15 = vld [vmem:[#allocation2 + $0x38] sm:$0xff]   ;;  %v369_v16 = vld [vmem:[%s613_s2] ss:$0 sm:$0xff]  ;;  %s549_s2 = smov [#allocation7]  }
  0x2c   :  { %405 = vmatpush3.bf16.msra.mxu0 %v458_v1  ;;  %443 = vmatpush3.bf16.msra.mxu1 %v458_v1  ;;  %s354_s11 = sshll.u32 %s549_s2, 4  ;;  %s355_s11 = int_to_ptr.vmem [resolvable:$true] %s354_s11 }
  0x2d   :  { %406 = vmatprep.subr.bf16.mxu0 %v459_v2  ;;  %436 = vmatprep.subr.bf16.mxu1 %v459_v2  ;;  %s517_s12 = scalar_lea.vmem %s355_s11, 2048  ;;  %p522_p3 = scmp.lt.s32.totalorder %s355_s11, %s355_s11 }
  0x2e   :  { %p518_p2 = scmp.ne.s32.totalorder %s355_s11, %s517_s12  ;;  %p523_p4 = scmp.lt.s32.totalorder %s517_s12, %s517_s12 }
  0x30   :  { %407 = vmatpush3.bf16.msra.mxu0 %v459_v2  ;;  %444 = vmatpush3.bf16.msra.mxu1 %v459_v2  ;;  %p524_p5 = por %p523_p4, %p522_p3 }
  0x31   :  { %408 = vmatprep.subr.bf16.mxu0 %v460_v3  ;;  %437 = vmatprep.subr.bf16.mxu1 %v460_v3 }
  0x32   :  { %p525_p6 = pnand %p524_p5, %p518_p2 }
  0x34   :  { %409 = vmatpush3.bf16.msra.mxu0 %v460_v3  ;;  %445 = vmatpush3.bf16.msra.mxu1 %v460_v3 }
  0x35   :  { %410 = vmatprep.subr.bf16.mxu0 %v461_v6  ;;  %438 = vmatprep.subr.bf16.mxu1 %v461_v6 }
  0x38   :  { %411 = vmatpush3.bf16.msra.mxu0 %v461_v6  ;;  %446 = vmatpush3.bf16.msra.mxu1 %v461_v6 }
  0x39   :  { %412 = vmatprep.subr.bf16.mxu0 %v462_v7  ;;  %439 = vmatprep.subr.bf16.mxu1 %v462_v7 }
  0x3c   :  { %413 = vmatpush3.bf16.msra.mxu0 %v462_v7  ;;  %447 = vmatpush3.bf16.msra.mxu1 %v462_v7 }
  0x3d   :  { %414 = vmatprep.subr.bf16.mxu0 %v463_v8  ;;  %440 = vmatprep.subr.bf16.mxu1 %v463_v8 }
  0x40   :  { %415 = vmatpush3.bf16.msra.mxu0 %v463_v8  ;;  %448 = vmatpush3.bf16.msra.mxu1 %v463_v8 }
  0x41   :  { %416 = vmatprep.subr.bf16.mxu0 %v464_v9  ;;  %441 = vmatprep.subr.bf16.mxu1 %v464_v9 }
  0x44   :  { %417 = vmatpush3.bf16.msra.mxu0 %v464_v9  ;;  %449 = vmatpush3.bf16.msra.mxu1 %v464_v9 }
  0x47   :  { %419 = vmatmul.mubr.bf16.vlgmr.msra.gmra.mrb[0].mxu0 %v467_v10  ;;  %427 = vmatmul.mubr.bf16.vlgmr.msra.gmra.mrb[0].mxu1 %v468_v11 }
  0x48   :  { %422 = vmatprep.mubr.bf16.mxu0 %v469_v12  ;;  %430 = vmatprep.mubr.bf16.mxu1 %v470_v13 }
  0x4f   :  { %423 = vmatmul.mubr.bf16.gmra.mrb[4].mxu0 %v471_v14  ;;  %431 = vmatmul.mubr.bf16.gmra.mrb[4].mxu1 %v472_v15 }
 0x11a   :  { %v420_v17 = vpop.f32.mrb[0].mxu0  ;;  %v428_v18 = vpop.f32.mrb[0].mxu1 }
 0x11b   :  { %v319_v19 = vadd.f32 %v420_v17, %v369_v16  ;;  %v327_v20 = vadd.f32 %v428_v18, %v369_v16  ;;  %v254_v21 = vpop.f32.mrb[1].mxu0  ;;  %v286_v22 = vpop.f32.mrb[1].mxu1 }
 0x11c   :  { %v317_v23 = vadd.f32 %v369_v16, %v254_v21  ;;  %v325_v24 = vadd.f32 %v369_v16, %v286_v22  ;;  %v421_v25 = vpop.f32.mrb[2].mxu0  ;;  %v429_v26 = vpop.f32.mrb[2].mxu1 }
 0x11d   :  { %335 = vst [vmem:[#allocation7 + $0x10] sm:$0xff] %v319_v19  ;;  %343 = vst [vmem:[#allocation7 + $0x50] sm:$0xff] %v327_v20  ;;  %v320_v27 = vadd.f32 %v421_v25, %v369_v16  ;;  %v328_v28 = vadd.f32 %v429_v26, %v369_v16  ;;  %v257_v29 = vpop.f32.mrb[3].mxu0  ;;  %v289_v30 = vpop.f32.mrb[3].mxu1 }
 0x11e   :  { %333 = vst [vmem:[#allocation7] sm:$0xff] %v317_v23  ;;  %341 = vst [vmem:[#allocation7 + $0x40] sm:$0xff] %v325_v24  ;;  %v318_v31 = vadd.f32 %v369_v16, %v257_v29  ;;  %v326_v32 = vadd.f32 %v369_v16, %v289_v30 }
 0x11f   :  { %336 = vst [vmem:[#allocation7 + $0x18] sm:$0xff] %v320_v27  ;;  %344 = vst [vmem:[#allocation7 + $0x58] sm:$0xff] %v328_v28 }
 0x120   :  { %334 = vst [vmem:[#allocation7 + $0x8] sm:$0xff] %v318_v31  ;;  %342 = vst [vmem:[#allocation7 + $0x48] sm:$0xff] %v326_v32 }
 0x122   :  { %v424_v33 = vpop.f32.mrb[4].mxu0  ;;  %v432_v34 = vpop.f32.mrb[4].mxu1 }
 0x123   :  { %v323_v35 = vadd.f32 %v424_v33, %v369_v16  ;;  %v331_v36 = vadd.f32 %v432_v34, %v369_v16  ;;  %v270_v37 = vpop.f32.mrb[5].mxu0  ;;  %v302_v38 = vpop.f32.mrb[5].mxu1 }
 0x124   :  { %v321_v39 = vadd.f32 %v369_v16, %v270_v37  ;;  %v329_v40 = vadd.f32 %v369_v16, %v302_v38  ;;  %v425_v41 = vpop.f32.mrb[6].mxu0  ;;  %v433_v42 = vpop.f32.mrb[6].mxu1 }
 0x125   :  { %339 = vst [vmem:[#allocation7 + $0x30] sm:$0xff] %v323_v35  ;;  %347 = vst [vmem:[#allocation7 + $0x70] sm:$0xff] %v331_v36  ;;  %v324_v43 = vadd.f32 %v425_v41, %v369_v16  ;;  %v332_v44 = vadd.f32 %v433_v42, %v369_v16  ;;  %v273_v45 = vpop.f32.mrb[7].mxu0  ;;  %v305_v46 = vpop.f32.mrb[7].mxu1 }
 0x126   :  { %337 = vst [vmem:[#allocation7 + $0x20] sm:$0xff] %v321_v39  ;;  %345 = vst [vmem:[#allocation7 + $0x60] sm:$0xff] %v329_v40  ;;  %v322_v47 = vadd.f32 %v369_v16, %v273_v45  ;;  %v330_v48 = vadd.f32 %v369_v16, %v305_v46 }
 0x127   :  { %340 = vst [vmem:[#allocation7 + $0x38] sm:$0xff] %v324_v43  ;;  %348 = vst [vmem:[#allocation7 + $0x78] sm:$0xff] %v332_v44 }
 0x128   :  { %338 = vst [vmem:[#allocation7 + $0x28] sm:$0xff] %v322_v47  ;;  %346 = vst [vmem:[#allocation7 + $0x68] sm:$0xff] %v330_v48 }
 0x129   :  { %528 = shalt.err (!%p525_p6)
}
 0x12a   :  { %s529_s15 = scalar_lea.hbm %s614_s3, 2048 }
 0x12b   :  { %p530_p7 = scmp.ne.s32.totalorder %s614_s3, %s529_s15  ;;  %p533_p8 = scmp.lt.u32.totalorder %s529_s15, %s614_s3 }
 0x12d   :  { %p535_p9 = pnand %p533_p8, %p530_p7 }
 0x12f   :  { %538 = shalt.err (!%p535_p9)
}
 0x130   :  { %s550_s20 = smov 128   ;;  %s551_s21 = smov 8  }
 0x131   :  { %360 = dma.vmem_to_hbm [thread:$0]  %s355_s11, 2048, %s614_s3, [#allocation4], %s550_s20, %s550_s20, %s551_s21  }
 0x132   :  { %543 = dma.done.wait [#allocation4], 2048  }
 0x133   :  { %544 = vsyncadd [#allocation4], 4294965248 }
 0x134   :  { %364 = vsyncpa [#allocation3], 1 }
 0x135   :  { %365 = vsyncpa [#allocation6], 1 }
 0x136   :  { %366 = vsyncpa [#allocation4], 1 }

</bundles_post_ra>
